<compile_context>
chip_gen: v5e
topology: v5e:2x2
jax: 0.10.0
libtpu: 0.0.40
codegen_flags: <defaults>
</compile_context>

<pallas_src>
import jax
import jax.numpy as jnp
from jax import lax
from jax.experimental import pallas as pl
from jax.experimental.pallas import tpu as pltpu

HIDDEN_SIZE = 128
INPUT_SIZE = 28
OUTPUT_SIZE = 10

INPUT_PAD = 32     # 28 -> 32: sublane-aligned K for the fused matmul
OUTPUT_PAD = 128   # 10 -> 128: lane-dense y stores (no masked vst.msk)


# ----------------------------- kernels --------------------------------------

def rnn_cell_kernel(xh_ref, w_comb_ref, b_comb_ref, why_ref, bhy_ref,
                    y_ref, h_ref):
    """Single RNN step; xh = [x_pad | h_prev] of shape (B, INPUT_PAD+HIDDEN)."""
    pre = (jnp.dot(xh_ref[...], w_comb_ref[...],
                   preferred_element_type=jnp.float32)
           + b_comb_ref[...])
    h = jnp.tanh(pre)
    h_ref[...] = h.astype(h_ref.dtype)
    y_ref[...] = (jnp.dot(h, why_ref[...], preferred_element_type=jnp.float32)
                  + bhy_ref[...]).astype(y_ref.dtype)


def rnn_seq_kernel(x_ref, h0_ref, wxh_ref, whh_ref, b_comb_ref, why_ref,
                   bhy_ref, y_ref, h_ref):
    """One timestep per grid iteration; h_ref is a VMEM-resident carry."""
    t = pl.program_id(0)

    @pl.when(t == 0)
    def _():
        h_ref[...] = h0_ref[...]

    h_prev = h_ref[...]
    pre = (jnp.dot(x_ref[...], wxh_ref[...], preferred_element_type=jnp.float32)
           + jnp.dot(h_prev, whh_ref[...], preferred_element_type=jnp.float32)
           + b_comb_ref[...])
    h = jnp.tanh(pre)
    h_ref[...] = h.astype(h_ref.dtype)
    y_ref[...] = (jnp.dot(h, why_ref[...], preferred_element_type=jnp.float32)
                  + bhy_ref[...]).astype(y_ref.dtype)


# ----------------------------- parameters -----------------------------------

def init_params(key):
    """nn.Linear-style init; weights stored transposed as (in, out)."""
    ks = jax.random.split(key, 6)

    def linear(kw, kb, fan_in, fan_out):
        bound = 1.0 / jnp.sqrt(jnp.float32(fan_in))
        w = jax.random.uniform(kw, (fan_in, fan_out), jnp.float32, -bound, bound)
        b = jax.random.uniform(kb, (1, fan_out), jnp.float32, -bound, bound)
        return w, b

    wxh, bxh = linear(ks[0], ks[1], INPUT_SIZE, HIDDEN_SIZE)
    whh, bhh = linear(ks[2], ks[3], HIDDEN_SIZE, HIDDEN_SIZE)
    why, bhy = linear(ks[4], ks[5], HIDDEN_SIZE, OUTPUT_SIZE)
    return (wxh, bxh, whh, bhh, why, bhy)


def prepare_kernel_params(params):
    """One-time fusion/padding of the nn.Linear weights into kernel layout."""
    wxh, bxh, whh, bhh, why, bhy = params
    wxh_pad = jnp.zeros((INPUT_PAD, HIDDEN_SIZE), jnp.float32)
    wxh_pad = wxh_pad.at[:INPUT_SIZE].set(wxh)
    w_comb = jnp.concatenate([wxh_pad, whh], axis=0)          # (160, 128)
    b_comb = bxh + bhh                                        # (1, 128)
    why_pad = jnp.zeros((HIDDEN_SIZE, OUTPUT_PAD), jnp.float32)
    why_pad = why_pad.at[:, :OUTPUT_SIZE].set(why)
    bhy_pad = jnp.zeros((1, OUTPUT_PAD), jnp.float32)
    bhy_pad = bhy_pad.at[:, :OUTPUT_SIZE].set(bhy)
    return dict(wxh_pad=wxh_pad, whh=whh, w_comb=w_comb, b_comb=b_comb,
                why_pad=why_pad, bhy_pad=bhy_pad)


def init_hidden(batch_size):
    return jnp.zeros((batch_size, HIDDEN_SIZE), jnp.float32)


# ----------------------------- wrappers -------------------------------------

@jax.jit
def rnn_forward(x, h_prev, kparams):
    """Single step, exactly RNN.forward(x, h_prev) -> (y, h)."""
    batch = x.shape[0]
    # Layout plumbing only: pad x 28->32 and present one fused [x|h] operand.
    x_pad = jnp.pad(x, ((0, 0), (0, INPUT_PAD - INPUT_SIZE)))
    xh = jnp.concatenate([x_pad, h_prev], axis=1)             # (B, 160)

    vmem = pl.BlockSpec(memory_space=pltpu.MemorySpace.VMEM)
    y_pad, h = pl.pallas_call(
        rnn_cell_kernel,
        out_shape=(
            jax.ShapeDtypeStruct((batch, OUTPUT_PAD), jnp.float32),
            jax.ShapeDtypeStruct((batch, HIDDEN_SIZE), jnp.float32),
        ),
        in_specs=[vmem] * 5,
        out_specs=(vmem, vmem),
    )(xh, kparams["w_comb"], kparams["b_comb"],
      kparams["why_pad"], kparams["bhy_pad"])
    return y_pad[:, :OUTPUT_SIZE], h


@jax.jit
def rnn_forward_sequence(xs, h0, kparams):
    """Apply the cell over a whole sequence inside ONE pallas_call.

    xs: (T, B, INPUT_SIZE) -> (ys (T, B, OUTPUT_SIZE), h_last (B, HIDDEN)).
    Weights are loaded once (constant index_map => block reused every step);
    the hidden state carry never touches HBM until the final writeback.
    """
    seq_len, batch, _ = xs.shape
    xs_pad = jnp.pad(xs, ((0, 0), (0, 0), (0, INPUT_PAD - INPUT_SIZE)))

    # NOTE: on v7x one could add a leading "parallel" batch grid axis to split
    # the (independent) batch across the two TensorCores; omitted at B=8.
    y_pad, h_last = pl.pallas_call(
        rnn_seq_kernel,
        out_shape=(
            jax.ShapeDtypeStruct((seq_len, batch, OUTPUT_PAD), jnp.float32),
            jax.ShapeDtypeStruct((batch, HIDDEN_SIZE), jnp.float32),
        ),
        grid=(seq_len,),
        in_specs=[
            pl.BlockSpec((None, batch, INPUT_PAD), lambda t: (t, 0, 0)),  # x_t streamed
            pl.BlockSpec((batch, HIDDEN_SIZE), lambda t: (0, 0)),         # h0
            pl.BlockSpec((INPUT_PAD, HIDDEN_SIZE), lambda t: (0, 0)),     # W_xh resident
            pl.BlockSpec((HIDDEN_SIZE, HIDDEN_SIZE), lambda t: (0, 0)),   # W_hh resident
            pl.BlockSpec((1, HIDDEN_SIZE), lambda t: (0, 0)),             # b_xh + b_hh
            pl.BlockSpec((HIDDEN_SIZE, OUTPUT_PAD), lambda t: (0, 0)),    # W_hy resident
            pl.BlockSpec((1, OUTPUT_PAD), lambda t: (0, 0)),              # b_hy
        ],
        out_specs=(
            pl.BlockSpec((None, batch, OUTPUT_PAD), lambda t: (t, 0, 0)),  # y_t per step
            pl.BlockSpec((batch, HIDDEN_SIZE), lambda t: (0, 0)),          # carried h
        ),
        compiler_params=pltpu.CompilerParams(
            dimension_semantics=("arbitrary",)),  # time is a true recurrence
    )(xs_pad, h0, kparams["wxh_pad"], kparams["whh"], kparams["b_comb"],
      kparams["why_pad"], kparams["bhy_pad"])
    return y_pad[..., :OUTPUT_SIZE], h_last


# ----------------------------- self-test ------------------------------------

if __name__ == "__main__":
    key = jax.random.PRNGKey(0)
    k_params, k_x, k_seq = jax.random.split(key, 3)

    batch = 8      # multiple of 8 -> sublane-aligned M
    seq_len = 16

    params = init_params(k_params)
    kparams = prepare_kernel_params(params)
    wxh, bxh, whh, bhh, why, bhy = params

    # ---- single step (exactly RNN.forward) ----
    x = jax.random.normal(k_x, (batch, INPUT_SIZE), jnp.float32)
    h_prev = init_hidden(batch)
    y, h = rnn_forward(x, h_prev, kparams)
    jax.block_until_ready((y, h))

    h_ref = jnp.tanh(x @ wxh + bxh + h_prev @ whh + bhh)
    y_ref = h_ref @ why + bhy
    assert y.shape == (batch, OUTPUT_SIZE) and h.shape == (batch, HIDDEN_SIZE)
    assert jnp.allclose(h, h_ref, atol=1e-4, rtol=1e-4)
    assert jnp.allclose(y, y_ref, atol=1e-4, rtol=1e-4)

    # ---- whole sequence, time loop inside one pallas_call ----
    xs = jax.random.normal(k_seq, (seq_len, batch, INPUT_SIZE), jnp.float32)
    ys, h_last = rnn_forward_sequence(xs, init_hidden(batch), kparams)
    jax.block_until_ready((ys, h_last))

    def scan_step(hc, x_t):
        h_new = jnp.tanh(x_t @ wxh + bxh + hc @ whh + bhh)
        return h_new, h_new @ why + bhy

    h_last_ref, ys_ref = lax.scan(scan_step, init_hidden(batch), xs)
    assert ys.shape == (seq_len, batch, OUTPUT_SIZE)
    assert h_last.shape == (batch, HIDDEN_SIZE)
    assert jnp.allclose(ys, ys_ref, atol=1e-4, rtol=1e-4)
    assert jnp.allclose(h_last, h_last_ref, atol=1e-4, rtol=1e-4)

    print("KERNEL_OK")
</pallas_src>

<mosaic_0001>
module attributes {stable_mosaic.version = 11 : i64} {
  func.func @rnn_cell_kernel(%arg0: memref<8x160xf32, #tpu.memory_space<vmem>>, %arg1: memref<160x128xf32, #tpu.memory_space<vmem>>, %arg2: memref<1x128xf32, #tpu.memory_space<vmem>>, %arg3: memref<128x128xf32, #tpu.memory_space<vmem>>, %arg4: memref<1x128xf32, #tpu.memory_space<vmem>>, %arg5: memref<8x128xf32, #tpu.memory_space<vmem>>, %arg6: memref<8x128xf32, #tpu.memory_space<vmem>>) attributes {dimension_semantics = [], scalar_prefetch = 0 : i64, scratch_operands = 0 : i64, tpu.core_type = #tpu.core_type<tc>} {
    %c0 = arith.constant 0 : index
    %c0_0 = arith.constant 0 : index
    %0 = vector.load %arg0[%c0, %c0_0] : memref<8x160xf32, #tpu.memory_space<vmem>>, vector<8x160xf32>
    %c0_1 = arith.constant 0 : index
    %c0_2 = arith.constant 0 : index
    %1 = vector.load %arg1[%c0_1, %c0_2] : memref<160x128xf32, #tpu.memory_space<vmem>>, vector<160x128xf32>
    %cst = arith.constant dense<0.000000e+00> : vector<8x128xf32>
    %2 = tpu.matmul %0, %1, %cst {dimension_numbers = #tpu.dot_dimension_numbers<[1], [0], [0], [1], [0, 0, 1, 1], [], []>} : vector<8x160xf32>, vector<160x128xf32>, vector<8x128xf32> -> vector<8x128xf32>
    %c0_3 = arith.constant 0 : index
    %c0_4 = arith.constant 0 : index
    %3 = vector.load %arg2[%c0_3, %c0_4] : memref<1x128xf32, #tpu.memory_space<vmem>>, vector<1x128xf32>
    %4 = vector.broadcast %3 : vector<1x128xf32> to vector<8x128xf32>
    %5 = arith.addf %2, %4 : vector<8x128xf32>
    %6 = math.tanh %5 : vector<8x128xf32>
    %c0_5 = arith.constant 0 : index
    %c0_6 = arith.constant 0 : index
    %7 = vector.load %arg6[%c0_5, %c0_6] : memref<8x128xf32, #tpu.memory_space<vmem>>, vector<8x128xf32>
    tpu.vector_store %arg6[%c0_5, %c0_6], %6 {strides = array<i32>} : memref<8x128xf32, #tpu.memory_space<vmem>>, vector<8x128xf32>,
    %c0_7 = arith.constant 0 : index
    %c0_8 = arith.constant 0 : index
    %8 = vector.load %arg3[%c0_7, %c0_8] : memref<128x128xf32, #tpu.memory_space<vmem>>, vector<128x128xf32>
    %cst_9 = arith.constant dense<0.000000e+00> : vector<8x128xf32>
    %9 = tpu.matmul %6, %8, %cst_9 {dimension_numbers = #tpu.dot_dimension_numbers<[1], [0], [0], [1], [0, 0, 1, 1], [], []>} : vector<8x128xf32>, vector<128x128xf32>, vector<8x128xf32> -> vector<8x128xf32>
    %c0_10 = arith.constant 0 : index
    %c0_11 = arith.constant 0 : index
    %10 = vector.load %arg4[%c0_10, %c0_11] : memref<1x128xf32, #tpu.memory_space<vmem>>, vector<1x128xf32>
    %11 = vector.broadcast %10 : vector<1x128xf32> to vector<8x128xf32>
    %12 = arith.addf %9, %11 : vector<8x128xf32>
    %c0_12 = arith.constant 0 : index
    %c0_13 = arith.constant 0 : index
    %13 = vector.load %arg5[%c0_12, %c0_13] : memref<8x128xf32, #tpu.memory_space<vmem>>, vector<8x128xf32>
    tpu.vector_store %arg5[%c0_12, %c0_13], %12 {strides = array<i32>} : memref<8x128xf32, #tpu.memory_space<vmem>>, vector<8x128xf32>,
    return
  }
}

</mosaic_0001>

<bundles_post_ra>
// kernel: rnn_forward.1
= control target key start
LH: loop header
LB: loop body
LE: loop exit
PB: predicated region body
PF: predicated region fallthrough
CT: control target
= control target key end

     0   :  { %12 = vsyncpa [#allocation3], 0  ;;  %s383_s0 = inlined_call_operand.vmem [shape: f32[8,160], index: 0, kind: input, shape index: {}]   ;;  %s384_s1 = inlined_call_operand.hbm [shape: f32[160,128], index: 1, kind: input, shape index: {}]   ;;  %s385_s2 = inlined_call_operand.vmem [shape: f32[1,128], index: 2, kind: input, shape index: {}]   ;;  %s386_s3 = inlined_call_operand.hbm [shape: f32[128,128], index: 3, kind: input, shape index: {}]   ;;  %s387_s4 = inlined_call_operand.vmem [shape: f32[1,128], index: 4, kind: input, shape index: {}]   ;;  %s388_s5 = inlined_call_operand.hbm [shape: f32[8,128], index: 5, kind: output, shape index: {0}]   ;;  %s389_s6 = inlined_call_operand.hbm [shape: f32[8,128], index: 6, kind: output, shape index: {1}]  }
   0x1   :  { %13 = vsyncpa [#allocation6], 0 }
   0x2   :  { %14 = vsyncpa [#allocation4], 0 }
   0x3   :  { %15 = vsyncpa [#allocation9], 0  ;;  %s22_s23 = sshll.u32 %s384_s1, 4  ;;  %s318_s24 = smov [#allocation2]   ;;  %s23_s23 = int_to_ptr.hbm [resolvable:$true] %s22_s23 }
   0x4   :  { %s24_s25 = sshll.u32 %s318_s24, 4  ;;  %s37_s28 = sshll.u32 %s386_s3, 4  ;;  %s25_s25 = int_to_ptr.vmem [resolvable:$true] %s24_s25  ;;  %s38_s28 = int_to_ptr.hbm [resolvable:$true] %s37_s28 }
   0x5   :  { %s319_s29 = smov 128   ;;  %s320_s30 = smov 8  }
   0x6   :  { %30 = dma.hbm_to_vmem [thread:$0]  %s23_s23, 2560, %s25_s25, [#allocation3], %s319_s29, %s319_s29, %s320_s30  }
   0x7   :  { %s321_s7 = smov [#allocation5]  }
   0x8   :  { %s39_s8 = sshll.u32 %s321_s7, 4  ;;  %s40_s8 = int_to_ptr.vmem [resolvable:$true] %s39_s8 }
   0x9   :  { %45 = dma.hbm_to_vmem [thread:$0]  %s38_s28, 2048, %s40_s8, [#allocation6], %s319_s29, %s319_s29, %s320_s30  }
   0xa   :  { %310 = dma.done.wait [#allocation3], 2560  }
   0xb   :  { %311 = vsyncadd [#allocation3], 4294964736 }
   0xc   :  { %312 = dma.done.wait [#allocation6], 2048  }
   0xd   :  { %313 = vsyncadd [#allocation6], 4294965248  ;;  %v73_v0 = vld [vmem:[#allocation2 + $0x78] sm:$0xff]  ;;  %v72_v1 = vld [vmem:[#allocation2 + $0x70] sm:$0xff]  ;;  %vm82_vm0 = vcmask 261120   ;;  %s187_s16 = sshll.u32 %s389_s6, 4  ;;  %s188_s16 = int_to_ptr.hbm [resolvable:$true] %s187_s16 }
   0xe   :  { %86 = vmatpush.msra.mxu0 %v73_v0  ;;  %v71_v2 = vld [vmem:[#allocation2 + $0x68] sm:$0xff]  ;;  %v70_v3 = vld [vmem:[#allocation2 + $0x60] sm:$0xff]  ;;  %v77_v4 = vld [vmem:[#allocation2 + $0x98] sm:$0xff]  ;;  %s176_s22 = sshll.u32 %s388_s5, 4  ;;  %s177_s22 = int_to_ptr.hbm [resolvable:$true] %s176_s22 }
   0xf   :  { %118 = vmatpush.msra.mxu1 %v77_v4  ;;  %v76_v5 = vld [vmem:[#allocation2 + $0x90] sm:$0xff]  ;;  %v69_v6 = vld [vmem:[#allocation2 + $0x58] sm:$0xff]  ;;  %v75_v7 = vld [vmem:[#allocation2 + $0x88] sm:$0xff] }
  0x10   :  { %87 = vmatpush.msra.mxu0 %v72_v1  ;;  %v143_v8 = vld [vmem:[#allocation5 + $0x78] sm:$0xff]  ;;  %v142_v9 = vld [vmem:[#allocation5 + $0x70] sm:$0xff]  ;;  %v74_v11 = vld [vmem:[#allocation2 + $0x80] sm:$0xff] }
  0x11   :  { %119 = vmatpush.msra.mxu1 %v76_v5  ;;  %v68_v10 = vld [vmem:[#allocation2 + $0x50] sm:$0xff]  ;;  %148 = vmatpush.msra.mxu2 %v143_v8  ;;  %v57_v12 = vld [vmem:[%s383_s0 + $0x8] sm:$0xff]  ;;  %v140_v15 = vld [vmem:[#allocation5 + $0x60] sm:$0xff] }
  0x12   :  { %88 = vmatpush.msra.mxu0 %v71_v2  ;;  %v141_v13 = vld [vmem:[#allocation5 + $0x68] sm:$0xff]  ;;  %v66_v16 = vld [vmem:[#allocation2 + $0x40] sm:$0xff]  ;;  %v139_v17 = vld [vmem:[#allocation5 + $0x58] sm:$0xff] }
  0x13   :  { %120 = vmatpush.msra.mxu1 %v75_v7  ;;  %v67_v14 = vld [vmem:[#allocation2 + $0x48] sm:$0xff]  ;;  %149 = vmatpush.msra.mxu2 %v142_v9  ;;  %v65_v18 = vld [vmem:[#allocation2 + $0x38] sm:$0xff]  ;;  %v138_v19 = vld [vmem:[#allocation5 + $0x50] sm:$0xff] }
  0x14   :  { %89 = vmatpush.msra.mxu0 %v70_v3  ;;  %v64_v20 = vld [vmem:[#allocation2 + $0x30] sm:$0xff]  ;;  %v137_v21 = vld [vmem:[#allocation5 + $0x48] sm:$0xff]  ;;  %v136_v23 = vld [vmem:[#allocation5 + $0x40] sm:$0xff] }
  0x15   :  { %121 = vmatpush.msra.mxu1 %v74_v11  ;;  %150 = vmatpush.msra.mxu2 %v141_v13  ;;  %v63_v22 = vld [vmem:[#allocation2 + $0x28] sm:$0xff]  ;;  %v62_v24 = vld [vmem:[#allocation2 + $0x20] sm:$0xff]  ;;  %v135_v25 = vld [vmem:[#allocation5 + $0x38] sm:$0xff] }
  0x16   :  { %90 = vmatpush.msra.mxu0 %v69_v6  ;;  %203 = vmatmul.msk.f32.vlgmr.msra.gmra.mxu1 %vm82_vm0, %v57_v12  ;;  %v61_v26 = vld [vmem:[#allocation2 + $0x18] sm:$0xff]  ;;  %v134_v27 = vld [vmem:[#allocation5 + $0x30] sm:$0xff]  ;;  %v59_v29 = vld [vmem:[#allocation2 + $0x8] sm:$0xff] }
  0x17   :  { %151 = vmatpush.msra.mxu2 %v140_v15  ;;  %v60_v28 = vld [vmem:[#allocation2 + $0x10] sm:$0xff]  ;;  %v58_v30 = vld [vmem:[#allocation2] sm:$0xff]  ;;  %v133_v32 = vld [vmem:[#allocation5 + $0x28] sm:$0xff] }
  0x18   :  { %91 = vmatpush.msra.mxu0 %v68_v10  ;;  %v56_v31 = vld [vmem:[%s383_s0] sm:$0xff]  ;;  %v131_v34 = vld [vmem:[#allocation5 + $0x18] sm:$0xff]  ;;  %v130_v35 = vld [vmem:[#allocation5 + $0x10] sm:$0xff]  ;;  %s322_s0 = smov [#allocation8]  }
  0x19   :  { %152 = vmatpush.msra.mxu2 %v139_v17  ;;  %v132_v33 = vld [vmem:[#allocation5 + $0x20] sm:$0xff]  ;;  %v129_v36 = vld [vmem:[#allocation5 + $0x8] sm:$0xff]  ;;  %s185_s13 = sshll.u32 %s322_s0, 4  ;;  %s186_s13 = int_to_ptr.vmem [resolvable:$true] %s185_s13 }
  0x1a   :  { %92 = vmatpush.msra.mxu0 %v67_v14  ;;  %v128_v37 = vld [vmem:[#allocation5] sm:$0xff] }
  0x1b   :  { %153 = vmatpush.msra.mxu2 %v138_v19  ;;  %v210_v38 = vld [vmem:[%s385_s2] ss:$0 sm:$0xff]  ;;  %s323_s2 = smov [#allocation7]  }
  0x1c   :  { %93 = vmatpush.msra.mxu0 %v66_v16  ;;  %v211_v44 = vld [vmem:[%s387_s4] ss:$0 sm:$0xff]  ;;  %s174_s19 = sshll.u32 %s323_s2, 4  ;;  %s175_s19 = int_to_ptr.vmem [resolvable:$true] %s174_s19 }
  0x1d   :  { %154 = vmatpush.msra.mxu2 %v137_v21 }
  0x1e   :  { %94 = vmatpush.msra.mxu0 %v65_v18 }
  0x1f   :  { %155 = vmatpush.msra.mxu2 %v136_v23 }
  0x20   :  { %95 = vmatpush.msra.mxu0 %v64_v20 }
  0x21   :  { %156 = vmatpush.msra.mxu2 %v135_v25 }
  0x22   :  { %96 = vmatpush.msra.mxu0 %v63_v22 }
  0x23   :  { %157 = vmatpush.msra.mxu2 %v134_v27 }
  0x24   :  { %97 = vmatpush.msra.mxu0 %v62_v24 }
  0x25   :  { %158 = vmatpush.msra.mxu2 %v133_v32 }
  0x26   :  { %98 = vmatpush.msra.mxu0 %v61_v26 }
  0x27   :  { %159 = vmatpush.msra.mxu2 %v132_v33 }
  0x28   :  { %99 = vmatpush.msra.mxu0 %v60_v28 }
  0x29   :  { %160 = vmatpush.msra.mxu2 %v131_v34 }
  0x2a   :  { %100 = vmatpush.msra.mxu0 %v59_v29 }
  0x2b   :  { %161 = vmatpush.msra.mxu2 %v130_v35 }
  0x2c   :  { %101 = vmatpush.msra.mxu0 %v58_v30 }
  0x2d   :  { %102 = vmatmul.f32.vlgmr.msra.gmra.mxu0 %v56_v31  ;;  %162 = vmatpush.msra.mxu2 %v129_v36 }
  0x2f   :  { %163 = vmatpush.msra.mxu2 %v128_v37 }
  0x93   :  { %v123_v40 = vpop.f32.mrf.mxu1 }
  0xaa   :  { %v103_v39 = vpop.f32.mrf.mxu0 }
  0xab   :  { %v104_v41 = vadd.f32 %v210_v38, %v103_v39 }
  0xad   :  { %v124_v42 = vadd.f32 %v123_v40, %v104_v41 }
  0xaf   :  { %212 = vtanh.f32 %v124_v42 }
  0xb5   :  { %v213_v43 = vpop.eup %212 }
  0xb6   :  { %127 = vst [vmem:[#allocation8] sm:$0xff] %v213_v43  ;;  %164 = vmatmul.f32.vlgmr.msra.gmra.mxu2 %v213_v43 }
  0xb7   :  { %190 = dma.vmem_to_hbm [thread:$0]  %s186_s13, 128, %s188_s16, [#allocation9]  }
 0x139   :  { %v165_v45 = vpop.f32.mrf.mxu2 }
 0x13a   :  { %v166_v46 = vadd.f32 %v211_v44, %v165_v45 }
 0x13c   :  { %168 = vst [vmem:[#allocation7] sm:$0xff] %v166_v46 }
 0x13d   :  { %179 = dma.vmem_to_hbm [thread:$0]  %s175_s19, 128, %s177_s22, [#allocation4]  }
 0x13e   :  { %314 = dma.done.wait [#allocation4], 128  }
 0x13f   :  { %315 = vsyncadd [#allocation4], 4294967168 }
 0x140   :  { %316 = dma.done.wait [#allocation9], 128  }
 0x141   :  { %317 = vsyncadd [#allocation9], 4294967168 }
 0x142   :  { %199 = vsyncpa [#allocation3], 1 }
 0x143   :  { %200 = vsyncpa [#allocation6], 1 }
 0x144   :  { %201 = vsyncpa [#allocation4], 1 }
 0x145   :  { %202 = vsyncpa [#allocation9], 1 }

</bundles_post_ra>
